<compile_context>
chip_gen: v5e
topology: v5e:2x2
jax: 0.10.0
libtpu: 0.0.40
codegen_flags: <defaults>
</compile_context>

<pallas_src>
import jax
import jax.numpy as jnp
from jax.experimental import pallas as pl
from jax.experimental.pallas import tpu as pltpu


def _attn_probs_kernel(v_ref, eo_ref, out_ref):
    # v_ref:   (1, 1, H)     projected query row for this batch element
    # eo_ref:  (1, Lt, H)    encoder-output tile (pipelined over the L grid axis)
    # out_ref: (1, n_lt, Lt) energies scratch -> final probs (resident over L axis)
    li = pl.program_id(1)
    lt = eo_ref.shape[1]

    v = v_ref[0]    # (1, H)
    eo = eo_ref[0]  # (Lt, H)

    # energies tile: (1, Lt) = v @ eo^T  (MXU; Lt on lanes -> lane-dense store).
    e = jax.lax.dot_general(
        v, eo, (((1,), (1,)), ((), ())),
        preferred_element_type=jnp.float32,
        precision=jax.lax.Precision.HIGHEST)

    out_ref[:, pl.ds(li, 1), :] = e.reshape(1, 1, lt).astype(out_ref.dtype)

    # Finalize once all L tiles of raw energies are written: numerically stable
    # softmax over all of L with an exact normalization.
    @pl.when(li == pl.num_programs(1) - 1)
    def _():
        en = out_ref[...].astype(jnp.float32)                      # (1, n_lt, Lt)
        m = jnp.max(jnp.max(en, axis=2, keepdims=True), axis=1, keepdims=True)
        ex = jnp.exp(en - m)
        denom = jnp.sum(jnp.sum(ex, axis=2, keepdims=True), axis=1, keepdims=True)
        out_ref[...] = (ex / denom).astype(out_ref.dtype)          # exact divide


def attn_general(hidden, encoder_outputs, W, bias=None, *, max_l_tile=512):
    """hidden: (B,1,H), encoder_outputs: (B,L,H), W: (H,H), bias: (1,H) -> (B,L,1).

    bias is accepted for API parity with nn.Linear; its contribution
    (bias . hidden[b]) is constant over L and cancels in the softmax.
    """
    del bias
    B, L, H = encoder_outputs.shape
    h2d = hidden.reshape(B, H).astype(jnp.float32)

    # Hoisted projection: v[b] = W^T hidden[b] == hidden[b] @ W (tiny; XLA handles it).
    v = jnp.dot(h2d, W.astype(jnp.float32),
                precision=jax.lax.Precision.HIGHEST).reshape(B, 1, H)

    # Largest lane-friendly L tile that divides L; fall back to the full L.
    lt = L
    for cand in (1024, 512, 256, 128):
        if cand <= max_l_tile and L % cand == 0:
            lt = cand
            break
    n_lt = L // lt

    probs = pl.pallas_call(
        _attn_probs_kernel,
        out_shape=jax.ShapeDtypeStruct((B, n_lt, lt), jnp.float32),
        grid=(B, n_lt),
        in_specs=[
            pl.BlockSpec((1, 1, H), lambda b, li: (b, 0, 0)),    # v (projected hidden)
            pl.BlockSpec((1, lt, H), lambda b, li: (b, li, 0)),  # encoder_outputs stream
        ],
        # Same block index across the L axis: the output stays VMEM-resident and
        # doubles as the energies scratch until the pl.when finalize.
        out_specs=pl.BlockSpec((1, n_lt, lt), lambda b, li: (b, 0, 0)),
        compiler_params=pltpu.CompilerParams(
            dimension_semantics=("parallel", "arbitrary")),
    )(v, encoder_outputs.astype(jnp.float32))

    return probs.reshape(B, L, 1)


def attn_general_ref(hidden, encoder_outputs, W, bias):
    # Pure-JAX reference of the PyTorch forward (method='general'), incl. bias.
    proj = jnp.einsum("blh,kh->blk", encoder_outputs, W,
                      precision=jax.lax.Precision.HIGHEST) + bias[0]   # (B,L,H)
    energies = jnp.einsum("blh,bh->bl", proj, hidden[:, 0, :],
                          precision=jax.lax.Precision.HIGHEST)         # (B,L)
    return jax.nn.softmax(energies, axis=1)[:, :, None]                # (B,L,1)


if __name__ == "__main__":
    B, L, H = 2, 8, 32  # batch, encoder max_len, hidden_size

    key = jax.random.PRNGKey(0)
    k1, k2, k3, k4 = jax.random.split(key, 4)

    hidden = jax.random.normal(k1, (B, 1, H), dtype=jnp.float32)
    encoder_outputs = jax.random.normal(k2, (B, L, H), dtype=jnp.float32)
    # Deterministic nn.Linear(hidden_size, hidden_size) params.
    W = jax.random.normal(k3, (H, H), dtype=jnp.float32) * (1.0 / jnp.sqrt(H))
    bias = jax.random.normal(k4, (1, H), dtype=jnp.float32) * 0.01

    out = attn_general(hidden, encoder_outputs, W, bias)
    out = jax.block_until_ready(out)

    ref = attn_general_ref(hidden, encoder_outputs, W, bias)
    assert out.shape == (B, L, 1)
    # Kernel drops the softmax-invariant bias term; everything else is full-f32.
    assert jnp.allclose(out, ref, atol=1e-4, rtol=1e-4), "mismatch vs reference"
    # Exact divide in the finalize -> rows sum to 1 to f32 rounding.
    assert jnp.allclose(jnp.sum(out[:, :, 0], axis=1), 1.0, atol=1e-5)

    print("KERNEL_OK")
</pallas_src>

<mosaic_0001>
module attributes {stable_mosaic.version = 11 : i64} {
  func.func @_attn_probs_kernel(%arg0: i32, %arg1: i32, %arg2: memref<1x1x32xf32, #tpu.memory_space<vmem>>, %arg3: memref<1x8x32xf32, #tpu.memory_space<vmem>>, %arg4: memref<1x1x8xf32, #tpu.memory_space<vmem>>) attributes {dimension_semantics = [#tpu.dimension_semantics<parallel>, #tpu.dimension_semantics<arbitrary>], iteration_bounds = array<i64: 2, 1>, scalar_prefetch = 0 : i64, scratch_operands = 0 : i64, tpu.core_type = #tpu.core_type<tc>, window_params = [{transform_indices = @transform_0, window_bounds = array<i64: 1, 1, 32>}, {transform_indices = @transform_1, window_bounds = array<i64: 1, 8, 32>}, {transform_indices = @transform_2, window_bounds = array<i64: 1, 1, 8>}]} {
    %c0 = arith.constant 0 : index
    %c0_0 = arith.constant 0 : index
    %c0_1 = arith.constant 0 : index
    %0 = vector.load %arg2[%c0, %c0_0, %c0_1] : memref<1x1x32xf32, #tpu.memory_space<vmem>>, vector<1x1x32xf32>
    %1 = vector.shape_cast %0 : vector<1x1x32xf32> to vector<1x32xf32>
    %c0_2 = arith.constant 0 : index
    %c0_3 = arith.constant 0 : index
    %c0_4 = arith.constant 0 : index
    %2 = vector.load %arg3[%c0_2, %c0_3, %c0_4] : memref<1x8x32xf32, #tpu.memory_space<vmem>>, vector<1x8x32xf32>
    %3 = vector.shape_cast %2 : vector<1x8x32xf32> to vector<8x32xf32>
    %cst = arith.constant dense<0.000000e+00> : vector<1x8xf32>
    %4 = tpu.matmul %1, %3, %cst {dimension_numbers = #tpu.dot_dimension_numbers<[1], [1], [0], [0], [0, 0, 1, 0], [], []>, precision = #tpu.contract_precision<fp32>} : vector<1x32xf32>, vector<8x32xf32>, vector<1x8xf32> -> vector<1x8xf32>
    %5 = vector.shape_cast %4 : vector<1x8xf32> to vector<1x1x8xf32>
    %c0_5 = arith.constant 0 : index
    %6 = arith.index_cast %arg1 : i32 to index
    %c0_6 = arith.constant 0 : index
    %7 = vector.load %arg4[%c0_5, %6, %c0_6] : memref<1x1x8xf32, #tpu.memory_space<vmem>>, vector<1x1x8xf32>
    tpu.vector_store %arg4[%c0_5, %6, %c0_6], %5 {strides = array<i32>} : memref<1x1x8xf32, #tpu.memory_space<vmem>>, vector<1x1x8xf32>,
    %c0_i32 = arith.constant 0 : i32
    %8 = arith.cmpi eq, %arg1, %c0_i32 : i32
    %9 = arith.extui %8 : i1 to i32
    %c0_i32_7 = arith.constant 0 : i32
    %10 = arith.cmpi ne, %9, %c0_i32_7 : i32
    scf.if %10 {
      %c0_8 = arith.constant 0 : index
      %c0_9 = arith.constant 0 : index
      %c0_10 = arith.constant 0 : index
      %11 = vector.load %arg4[%c0_8, %c0_9, %c0_10] : memref<1x1x8xf32, #tpu.memory_space<vmem>>, vector<1x1x8xf32>
      %cst_11 = arith.constant dense<0xFF800000> : vector<1x1xf32>
      %12 = vector.multi_reduction <maximumf>, %11, %cst_11 [2] : vector<1x1x8xf32> to vector<1x1xf32>
      %13 = vector.shape_cast %12 : vector<1x1xf32> to vector<1x1x1xf32>
      %cst_12 = arith.constant dense<0xFF800000> : vector<1x1xf32>
      %14 = vector.multi_reduction <maximumf>, %13, %cst_12 [1] : vector<1x1x1xf32> to vector<1x1xf32>
      %15 = vector.shape_cast %14 : vector<1x1xf32> to vector<1x1x1xf32>
      %16 = vector.broadcast %15 : vector<1x1x1xf32> to vector<1x1x8xf32>
      %17 = arith.subf %11, %16 : vector<1x1x8xf32>
      %18 = math.exp %17 : vector<1x1x8xf32>
      %cst_13 = arith.constant dense<0.000000e+00> : vector<1x1xf32>
      %19 = vector.multi_reduction <add>, %18, %cst_13 [2] : vector<1x1x8xf32> to vector<1x1xf32>
      %20 = vector.shape_cast %19 : vector<1x1xf32> to vector<1x1x1xf32>
      %cst_14 = arith.constant dense<0.000000e+00> : vector<1x1xf32>
      %21 = vector.multi_reduction <add>, %20, %cst_14 [1] : vector<1x1x1xf32> to vector<1x1xf32>
      %22 = vector.shape_cast %21 : vector<1x1xf32> to vector<1x1x1xf32>
      %23 = vector.broadcast %22 : vector<1x1x1xf32> to vector<1x1x8xf32>
      %24 = arith.divf %18, %23 : vector<1x1x8xf32>
      %c0_15 = arith.constant 0 : index
      %c0_16 = arith.constant 0 : index
      %c0_17 = arith.constant 0 : index
      %25 = vector.load %arg4[%c0_15, %c0_16, %c0_17] : memref<1x1x8xf32, #tpu.memory_space<vmem>>, vector<1x1x8xf32>
      tpu.vector_store %arg4[%c0_15, %c0_16, %c0_17], %24 {strides = array<i32>} : memref<1x1x8xf32, #tpu.memory_space<vmem>>, vector<1x1x8xf32>,
    } else {
    }
    return
  }
  func.func @transform_0(%arg0: i32, %arg1: i32) -> (i32, i32, i32) {
    %c0_i32 = arith.constant 0 : i32
    %c0_i32_0 = arith.constant 0 : i32
    %c0_i32_1 = arith.constant 0 : i32
    return %arg0, %c0_i32, %c0_i32_0 : i32, i32, i32
  }
  func.func @transform_1(%arg0: i32, %arg1: i32) -> (i32, i32, i32) {
    %c0_i32 = arith.constant 0 : i32
    %c0_i32_0 = arith.constant 0 : i32
    return %arg0, %arg1, %c0_i32 : i32, i32, i32
  }
  func.func @transform_2(%arg0: i32, %arg1: i32) -> (i32, i32, i32) {
    %c0_i32 = arith.constant 0 : i32
    %c0_i32_0 = arith.constant 0 : i32
    %c0_i32_1 = arith.constant 0 : i32
    return %arg0, %c0_i32, %c0_i32_0 : i32, i32, i32
  }
}

</mosaic_0001>

<bundles_post_ra>
// kernel: tpu_custom_call.1
= control target key start
LH: loop header
LB: loop body
LE: loop exit
PB: predicated region body
PF: predicated region fallthrough
CT: control target
= control target key end

     0   :  { %7 = vsyncpa [#allocation3], 0  ;;  %s900_s0 = inlined_call_operand.hbm [shape: f32[2,1,32], index: 0, kind: input, shape index: {}]   ;;  %s901_s1 = inlined_call_operand.hbm [shape: f32[2,8,32], index: 1, kind: input, shape index: {}]   ;;  %s902_s2 = inlined_call_operand.hbm [shape: f32[2,1,8], index: 2, kind: output, shape index: {}]  }
   0x1   :  { %9 = vsyncpa [#allocation3 + $0x1], 0 }
   0x2   :  { %10 = vsyncpa [#allocation6], 0 }
   0x3   :  { %12 = vsyncpa [#allocation6 + $0x1], 0 }
   0x4   :  { %13 = vsyncpa [#allocation4], 0 }
   0x5   :  { %15 = vsyncpa [#allocation4 + $0x1], 0  ;;  %s751_s9 = smov 0   ;;  %s753_s10 = smov 0  }
   0x6   :  { %s755_s11 = smov 0   ;;  %s757_s12 = smov 0  }
   0x7   :  { %s759_s13 = smov 0   ;;  %s761_s14 = smov 0  }
   0x8 LB: > { %s507_s15 = sadd.s32 4294967295, %s734_s14   ;;  %s508_s16 = sadd.s32 4294967294, %s734_s14   ;;  %s734_s14 = sphi %s761_s14, %s21_s14   ;;  %s730_s13 = sphi %s759_s13, %s912_s13   ;;  %s726_s12 = sphi %s757_s12, %s911_s12   ;;  %s722_s11 = sphi %s755_s11, %s910_s11   ;;  %s718_s10 = sphi %s753_s10, %s909_s10   ;;  %s714_s9 = sphi %s751_s9, %s908_s9  }
   0x9   : > { %s33_s17 = sadd.s32 1, %s730_s13  ;;  %s40_s18 = sadd.s32 1, %s722_s11 }
   0xa   : > { %p35_p0 = scmp.ge.s32.totalorder %s33_s17, 2  ;;  %p47_p1 = scmp.ne.s32.totalorder %s722_s11, %s718_s10 }
   0xb   : > { %p48_p2 = scmp.eq.s32.totalorder %s734_s14, 0  ;;  %p53_p3 = scmp.ne.s32.totalorder %s718_s10, %s714_s9 }
   0xc   : > { %s914_s17 = smov (%p35_p0, %s33_s17), 0  ;;  %p54_p5 = scmp.eq.s32.totalorder %s507_s15, 0 }
   0xd   : > { %p792_p4 = por %p48_p2, %p47_p1  ;;  %s37_s20 = ssub.s32 %s730_s13, %s914_s17 }
   0xe   : > { %p105_p6 = scmp.eq.s32.totalorder %s507_s15, 1  ;;  %p38_p7 = scmp.eq.s32.totalorder %s37_s20, 0 }
   0xf   : > { %p798_p8 = por %p54_p5, %p53_p3  ;;  %p111_p10 = scmp.eq.s32.totalorder %s508_s16, 1 }
  0x10   : > { %p802_p9 = por %p105_p6, %p47_p1  ;;  %p510_p12 = scmp.ge.s32.totalorder %s734_s14, 2 }
  0x11   : > { %s807_s23 = scalar_select %p38_p7, %s722_s11, %s40_s18  }
  0x12   : > { %p809_p11 = por %p111_p10, %p53_p3  ;;  %p534_p13 = scmp.lt.s32.totalorder %s734_s14, 2 }
  0x13   : > { %s131_s25 = sand.u32 1, %s722_s11   ;;  %s137_s28 = scalar_lea.hbm %s900_s0, %s730_s13 }
  0x14   : > { %s134_s29 = scalar_lea.vmem [#allocation2], %s131_s25  ;;  %s139_s3 = sshll.u32 %s137_s28, 4  ;;  %s140_s3 = int_to_ptr.hbm [resolvable:$true] %s139_s3 }
  0x15   : > { %s141_s30 = sshll.u32 %s134_s29, 4  ;;  %p822_p0 = pnand %p534_p13, %p792_p4  ;;  %s142_s30 = int_to_ptr.vmem [resolvable:$true] %s141_s30 }
  0x16   : > { %p513_p1 = scmp.ge.s32.totalorder %s734_s14, 1  ;;  %p166_p2 = scmp.lt.s32.totalorder %s734_s14, 3 }
  0x17   : > { %s132_s5 = scalar_lea.sflag [#allocation3], %s131_s25  ;;  %s511_s6 = sshll.u32 %s131_s25, 3 }
  0x18   : > { %526 = dma.hbm_to_vmem [thread:$0]  (!%p822_p0), %s140_s3, 16, %s142_s30, %s132_s5  }
  0x19   : > { %p167_p3 = pnand %p513_p1, %p166_p2  ;;  %s512_s7 = sshll.u32 %s730_s13, 3 }
  0x1a   : > { %s157_s16 = scalar_lea.hbm %s901_s1, %s512_s7  ;;  %s152_s18 = scalar_lea.vmem [#allocation5], %s511_s6 }
  0x1b   : > { %s161_s19 = sshll.u32 %s152_s18, 4  ;;  %s159_s20 = sshll.u32 %s157_s16, 4  ;;  %s162_s19 = int_to_ptr.vmem [resolvable:$true] %s161_s19  ;;  %s160_s20 = int_to_ptr.hbm [resolvable:$true] %s159_s20 }
  0x1c   : > { %s149_s26 = scalar_lea.sflag [#allocation6], %s131_s25  ;;  %170 = sbr.rel (%p167_p3) target bundleno = 463 (0x1cf), region = 28 }
  0x1d   : > { %529 = dma.hbm_to_vmem [thread:$0]  (!%p822_p0), %s160_s20, 128, %s162_s19, %s149_s26  }
  0x1e   : > { %s837_s27 = sand.u32 (!%p167_p3), 1, %s718_s10  }
  0x1f   : > { %s173_s28 = scalar_lea.sflag (!%p167_p3), [#allocation3], %s837_s27  ;;  %s175_s29 = scalar_lea.vmem (!%p167_p3), [#allocation2], %s837_s27 }
  0x21   : > { %701 = dma.done.wait (%p798_p8), %s173_s28, 16  }
  0x22   : > { %703 = vsyncadd (%p798_p8), %s173_s28, 4294967280  ;;  %s514_s25 = sshll.u32 %s837_s27, 3  ;;  %s182_s30 = scalar_lea.sflag [#allocation6], %s837_s27 }
  0x23   : > { %s185_s3 = scalar_lea.vmem [#allocation5], %s514_s25 }
  0x24   : > { %705 = dma.done.wait (%p798_p8), %s182_s30, 128  }
  0x25   : > { %707 = vsyncadd (%p798_p8), %s182_s30, 4294967168  ;;  %vm212_vm0 = vcmask 261120   ;;  %v211_v0 = vld [vmem:[%s185_s3] sm:$0xff]  ;;  %v210_v1 = vld [vmem:[%s175_s29] sm:$0x1]  ;;  %vm366_vm1 = vcmask 57344   ;;  %s408_s6 = scalar_lea.hbm %s902_s2, %s726_s12 }
  0x26   : > { %v217_v2 = vsel %vm212_vm0, %v211_v0, 0  ;;  %v214_v3 = vsel %vm212_vm0, %v210_v1, 0  ;;  %s852_s21 = scalar_lea.vmem [#allocation7], %s837_s27  ;;  %s412_s8 = sshll.u32 %s408_s6, 4  ;;  %s413_s8 = int_to_ptr.hbm [resolvable:$true] %s412_s8 }
  0x27   : > { %v234_v4 = vand.u32 4294901760, %v217_v2  ;;  %v236_v5 = vand.u32 4294901760, %v214_v3  ;;  %s410_s7 = sshll.u32 %s852_s21, 4  ;;  %s400_s15 = scalar_lea.sflag [#allocation4], %s837_s27  ;;  %s411_s7 = int_to_ptr.vmem [resolvable:$true] %s410_s7 }
  0x28   : > { %s662_s16 = sshra.s32 %s413_s8, 4  ;;  %s668_s20 = scalar_lea.hbm %s902_s2, 2  ;;  %s663_s16 = int_to_ptr.hbm [resolvable:$true] %s662_s16 }
  0x29   : > { %v261_v6 = vsub.f32 %v217_v2, %v234_v4  ;;  %235 = vmatpush.xpose.msra.mxu0 %v234_v4  ;;  %311 = vmatpush.xpose.msra.mxu3 %v234_v4  ;;  %v237_v7 = vsub.f32 %v214_v3, %v236_v5  ;;  %s664_s18 = scalar_lea.hbm %s663_s16, 1  ;;  %p669_p7 = scmp.lt.s32.totalorder %s663_s16, %s902_s2 }
  0x2a   : > { %p665_p4 = scmp.ne.s32.totalorder %s663_s16, %s664_s18  ;;  %p670_p8 = scmp.lt.s32.totalorder %s668_s20, %s664_s18 }
  0x2b   : > { %288 = vmatpush.xpose.msra.mxu2 %v261_v6  ;;  %v262_v8 = vand.u32 4294901760, %v261_v6  ;;  %v238_v9 = vand.u32 4294901760, %v237_v7 }
  0x2c   : > { %p666_p5 = pnand %p665_p4, %p802_p9  ;;  %p671_p10 = por %p670_p8, %p669_p7 }
  0x2d   : > { %v263_v10 = vsub.f32 %v261_v6, %v262_v8  ;;  %v239_v11 = vsub.f32 %v237_v7, %v238_v9  ;;  %315 = vmatmul.f32.vlgmr.msra.gmra.mxu3 %v238_v9  ;;  %337 = vmatpush.xpose.msrb.mxu0 %v262_v8 }
  0x2e   : > { %291 = vmatmul.f32.vlgmr.msra.gmra.mxu2 %v237_v7  ;;  %p667_p6 = pneg %p666_p5 }
  0x2f   : > { %v264_v12 = vand.u32 4294901760, %v263_v10  ;;  %v240_v13 = vand.u32 4294901760, %v239_v11 }
  0x30   : > { %p672_p13 = pnand %p671_p10, %p667_p6 }
  0x31   : > { %265 = vmatpush.xpose.msra.mxu1 %v264_v12  ;;  %241 = vmatmul.f32.vlgmr.msra.gmra.mxu0 %v240_v13 }
  0x34   : > { %267 = vmatmul.f32.vlgmr.msra.gmra.mxu1 %v236_v5 }
  0x35   : > { %359 = vmatpush.xpose.msrb.mxu1 %v234_v4 }
  0x39   : > { %339 = vmatmul.f32.vlgmr.msrb.gmra.mxu0 %v236_v5 }
  0x3c   : > { %361 = vmatmul.f32.vlgmr.msrb.gmra.mxu1 %v236_v5 }
  0xae   : > { %v242_v14 = vpop.f32.mrf.mxu0 }
  0xb0   : > { %v316_v18 = vpop.f32.mrf.mxu3 }
  0xb1   : > { %v268_v15 = vpop.f32.mrf.mxu1  ;;  %v292_v16 = vpop.f32.mrf.mxu2 }
  0xb2   : > { %v269_v17 = vadd.f32 %v268_v15, %v242_v14 }
  0xb4   : > { %v293_v19 = vadd.f32 %v292_v16, %v269_v17 }
  0xb6   : > { %v317_v20 = vadd.f32 %v316_v18, %v293_v19  ;;  %v340_v21 = vpop.f32.mrf.mxu0 }
  0xb8   : > { %v341_v22 = vadd.f32 %v340_v21, %v317_v20 }
  0xb9   : > { %v362_v23 = vpop.f32.mrf.mxu1 }
  0xba   : > { %v363_v24 = vadd.f32 %v362_v23, %v341_v22 }
  0xbc   : > { %367 = vst.msk [vmem:[%s852_s21] sm:$0x1] %vm366_vm1, %v363_v24 }
  0xc3   : > { %v372_v25 = vld [vmem:[%s852_s21] sm:$0x1] }
  0xc4   : > { %v373_v26 = vsel %vm366_vm1, %v372_v25, -inf }
  0xc5   : > { %374 = vmax.xlane.f32.xlu0 %v373_v26 }
 0x138   : > { %v375_v27 = vpop.xlane.xlu0 %374 }
 0x139   : > { %v376_v28 = vsub.f32 %v372_v25, %v375_v27 }
 0x13b   : > { %v377_v29 = vmul.f32 1.442695, %v376_v28 }
 0x13d   : > { %584 = vpow2.f32 %v377_v29 }
 0x143   : > { %v585_v30 = vpop.eup %584 }
 0x144   : > { %v379_v31 = vsel %vm366_vm1, %v585_v30, 0.0 }
 0x145   : > { %380 = vadd.xlane.f32.xlu0 %v379_v31 }
 0x1b8   : > { %v381_v32 = vpop.xlane.xlu0 %380 }
 0x1b9   : > { %586 = vrcp.f32 %v381_v32  ;;  %v394_v36 = vand.u32 2147483648, %v381_v32  ;;  %v392_v38 = vand.u32 2147483647, %v381_v32  ;;  %vm388_vm3 = vweird.f32 %v381_v32 }
 0x1bb   : > { %v395_v40 = vor.u32 1.1754944e-38, %v394_v36  ;;  %vm393_vm5 = vcmp.eq.f32.partialorder %v392_v38, 8.507059e+37 }
 0x1bf   : > { %v587_v33 = vpop.eup %586 }
 0x1c0   : > { %v384_v34 = vmul.f32 %v587_v33, %v381_v32  ;;  %vm389_vm2 = vweird.f32 %v587_v33 }
 0x1c1   : > { %vm390_vm4 = vmor %vm388_vm3, %vm389_vm2 }
 0x1c2   : > { %v385_v35 = vsub.f32 1.0, %v384_v34 }
 0x1c4   : > { %v386_v37 = vmul.f32 %v587_v33, %v385_v35 }
 0x1c6   : > { %v387_v39 = vadd.f32 %v587_v33, %v386_v37 }
 0x1c8   : > { %v391_v41 = vsel %vm390_vm4, %v587_v33, %v387_v39 }
 0x1c9   : > { %v396_v42 = vsel %vm393_vm5, %v395_v40, %v391_v41 }
 0x1ca   : > { %v397_v43 = vmul.f32 %v585_v30, %v396_v42 }
 0x1cc   : > { %398 = vst.msk [vmem:[%s852_s21] sm:$0x1] %vm366_vm1, %v397_v43 }
 0x1cd   : > { %675 = shalt.err (!%p672_p13)
}
 0x1ce   : > { %521 = dma.vmem_to_hbm [thread:$0]  (%p802_p9), %s411_s7, 16, %s413_s8, %s400_s15  }
 0x1cf PF: > { %s424_s27 = sand.u32 1, %s714_s9   ;;  %p531_p0 = pnand %p510_p12, %p809_p11 }
 0x1d0   : > { %s425_s29 = scalar_lea.sflag [#allocation4], %s424_s27 }
 0x1d1   : > { %p532_p1 = pneg %p531_p0 }
 0x1d3   : > { %709 = dma.done.wait (%p532_p1), %s425_s29, 16  }
 0x1d4   : > { %711 = vsyncadd (%p532_p1), %s425_s29, 4294967280  ;;  %s21_s14 = sadd.s32 1, %s734_s14   ;;  %s908_s9 = smov %s718_s10 }
 0x1d5   : > { %p18_p2 = scmp.ge.s32.totalorder %s21_s14, 4   ;;  %s909_s10 = smov %s722_s11 }
 0x1d6   : > { %s910_s11 = smov %s807_s23  ;;  %s911_s12 = smov %s730_s13 }
 0x1d7   : > { %s912_s13 = smov %s914_s17  ;;  %20 = sbr.rel (!%p18_p2) target bundleno = 8 (0x8), region = 91 }
 0x1dc   :  { %430 = vsyncpa [#allocation3], 1 }
 0x1dd   :  { %432 = vsyncpa [#allocation3 + $0x1], 1 }
 0x1de   :  { %433 = vsyncpa [#allocation6], 1 }
 0x1df   :  { %435 = vsyncpa [#allocation6 + $0x1], 1 }
 0x1e0   :  { %436 = vsyncpa [#allocation4], 1 }
 0x1e1   :  { %438 = vsyncpa [#allocation4 + $0x1], 1 }

</bundles_post_ra>
